<compile_context>
chip_gen: v7x
topology: tpu7x:2x2x1
jax: 0.10.0
libtpu: 0.0.40
codegen_flags: <defaults>
</compile_context>

<pallas_src>
import math

import jax
import jax.numpy as jnp
import numpy as np
from jax.experimental import pallas as pl
from jax.experimental.pallas import tpu as pltpu


def _round_up(x: int, m: int) -> int:
    return ((x + m - 1) // m) * m


# ---------------------------------------------------------------------------
# Prologue kernel: z = fc(h) and fused attention logits.  O(N * D) work.
# ---------------------------------------------------------------------------
def _prologue_kernel(h_ref, w_ref, a_ref, z_ref, ea_ref):
    # z = h @ W : f32 accumulation on the MXU, stored in the compute dtype.
    z_f32 = jnp.dot(h_ref[...], w_ref[...], preferred_element_type=jnp.float32)
    z_cd = z_f32.astype(z_ref.dtype)
    z_ref[...] = z_cd
    # Fused attention vectors: A[:, 0] = a_l (src term), A[:, 1] = a_r (dst term),
    # remaining 126 lanes are zero.  One lane-dense MXU pass instead of two
    # 1-column passes.
    ea_ref[...] = jnp.dot(z_cd, a_ref[...], preferred_element_type=jnp.float32)


# ---------------------------------------------------------------------------
# Main kernel: masked online softmax over incoming edges + aggregation.
# grid = (dst_tiles [parallel], src_tiles [arbitrary])
# ---------------------------------------------------------------------------
def _attn_aggregate_kernel(er_ref, elT_ref, adj_ref, z_ref, out_ref,
                           m_sc, l_sc, acc_sc):
    j = pl.program_id(1)

    @pl.when(j == 0)
    def _init():
        m_sc[...] = jnp.full(m_sc.shape, -1e30, jnp.float32)
        l_sc[...] = jnp.zeros(l_sc.shape, jnp.float32)
        acc_sc[...] = jnp.zeros(acc_sc.shape, jnp.float32)

    mask = adj_ref[...] != 0                                   # [Td, Ts] bool (adj int8)
    # e[dst, src] = z_dst @ a_r + z_src @ a_l  (pure broadcast add, no transpose)
    e = er_ref[...] + elT_ref[...]                             # [Td,1] + [1,Ts] -> [Td,Ts]
    e_masked = jnp.where(mask, e, jnp.float32(-1e30))

    m_prev = m_sc[...]
    m_new = jnp.maximum(m_prev, jnp.max(e_masked, axis=1, keepdims=True))
    scale = jnp.exp(m_prev - m_new)
    # Fused mask + exp: single where, no extra N x N multiply.
    p = jnp.where(mask, jnp.exp(e - m_new), jnp.float32(0.0))  # [Td, Ts] f32

    l_sc[...] = scale * l_sc[...] + jnp.sum(p, axis=1, keepdims=True)
    acc_sc[...] = scale * acc_sc[...] + jnp.dot(
        p.astype(z_ref.dtype), z_ref[...], preferred_element_type=jnp.float32)
    m_sc[...] = m_new

    @pl.when(j == pl.num_programs(1) - 1)
    def _finalize():
        l = l_sc[...]
        l_safe = jnp.maximum(l, jnp.float32(1e-30))            # guard: 0 in-degree -> 0 out
        r = pl.reciprocal(l_safe, approx=True)                 # EUP vrcp
        r = r * (2.0 - l_safe * r)                             # one Newton step -> ~f32 accuracy
        out_ref[...] = (acc_sc[...] * r).astype(out_ref.dtype)


# ---------------------------------------------------------------------------
# Wrapper
# ---------------------------------------------------------------------------
def graph_layer(h, W, a_l, a_r, adj, *, dst_tile=256, src_tile=512,
                compute_dtype=jnp.bfloat16):
    """GraphLayer forward.

    h   : [N, in_dim]  f32     node features
    W   : [in_dim, out_dim]    fc weight (transposed vs torch [out_dim, in_dim])
    a_l : [out_dim, 1]         attn_fc weight half applied to the src z
    a_r : [out_dim, 1]         attn_fc weight half applied to the dst z
    adj : [N, N]  any dtype    adj[dst, src] != 0 iff edge src -> dst exists
    returns [N, out_dim] f32
    """
    N, in_dim = h.shape
    out_dim = W.shape[1]

    # Lane-dense / tile-aligned padded sizes.
    d_pad = max(128, _round_up(out_dim, 128))
    in_pad = max(128, _round_up(in_dim, 128))
    granule = math.lcm(dst_tile, src_tile)
    n_pad = _round_up(N, granule)

    cd = compute_dtype
    # Padded, compute-dtype operands (zero padding keeps the math exact).
    h_p = jnp.zeros((n_pad, in_pad), cd).at[:N, :in_dim].set(h.astype(cd))
    w_p = jnp.zeros((in_pad, d_pad), cd).at[:in_dim, :out_dim].set(W.astype(cd))
    a_p = jnp.zeros((d_pad, 128), cd)
    a_p = a_p.at[:out_dim, 0].set(a_l[:, 0].astype(cd))
    a_p = a_p.at[:out_dim, 1].set(a_r[:, 0].astype(cd))
    # int8 adjacency: the only O(N^2) input -> 4x less HBM traffic than f32.
    adj_p = jnp.zeros((n_pad, n_pad), jnp.int8).at[:N, :N].set(
        (adj != 0).astype(jnp.int8))

    n_dst = n_pad // dst_tile
    n_src = n_pad // src_tile

    # ---- Prologue: z and fused attention logits --------------------------
    z_p, ea = pl.pallas_call(
        _prologue_kernel,
        out_shape=(jax.ShapeDtypeStruct((n_pad, d_pad), cd),
                   jax.ShapeDtypeStruct((n_pad, 128), jnp.float32)),
        grid_spec=pltpu.PrefetchScalarGridSpec(
            num_scalar_prefetch=0,
            grid=(n_dst,),
            in_specs=[
                pl.BlockSpec((dst_tile, in_pad), lambda i: (i, 0)),
                pl.BlockSpec((in_pad, d_pad), lambda i: (0, 0)),
                pl.BlockSpec((d_pad, 128), lambda i: (0, 0)),
            ],
            out_specs=(
                pl.BlockSpec((dst_tile, d_pad), lambda i: (i, 0)),
                pl.BlockSpec((dst_tile, 128), lambda i: (i, 0)),
            )),
        compiler_params=pltpu.CompilerParams(dimension_semantics=("parallel",)),
    )(h_p, w_p, a_p)

    er = ea[:, 1:2]                       # [N_pad, 1] dst-side logit term (f32)
    elT = ea[:, 0:1].reshape(1, n_pad)    # [1, N_pad] src-side term, one-time relayout

    # ---- Main pass: masked online softmax + aggregation -------------------
    cd_bytes = jnp.dtype(cd).itemsize
    cost = pl.CostEstimate(
        flops=2 * n_pad * n_pad * d_pad + 8 * n_pad * n_pad,
        transcendentals=n_pad * n_pad + 2 * n_pad,
        bytes_accessed=(n_pad * n_pad                          # adj (int8)
                        + n_dst * n_pad * d_pad * cd_bytes     # z streamed per dst tile
                        + n_pad * d_pad * 4                    # output
                        + (n_dst + n_src) * n_pad * 4),        # er / elT tiles
    )

    out_p = pl.pallas_call(
        _attn_aggregate_kernel,
        out_shape=jax.ShapeDtypeStruct((n_pad, d_pad), jnp.float32),
        grid_spec=pltpu.PrefetchScalarGridSpec(
            num_scalar_prefetch=0,
            grid=(n_dst, n_src),
            in_specs=[
                pl.BlockSpec((dst_tile, 1), lambda i, j: (i, 0)),          # er
                pl.BlockSpec((1, src_tile), lambda i, j: (0, j)),          # elT
                pl.BlockSpec((dst_tile, src_tile), lambda i, j: (i, j)),   # adj (int8)
                pl.BlockSpec((src_tile, d_pad), lambda i, j: (j, 0)),      # z (src tile)
            ],
            out_specs=pl.BlockSpec((dst_tile, d_pad), lambda i, j: (i, 0)),
            scratch_shapes=[
                pltpu.VMEM((dst_tile, 1), jnp.float32),       # running max
                pltpu.VMEM((dst_tile, 1), jnp.float32),       # running denom
                pltpu.VMEM((dst_tile, d_pad), jnp.float32),   # accumulator
            ]),
        compiler_params=pltpu.CompilerParams(
            dimension_semantics=("parallel", "arbitrary")),
        cost_estimate=cost,
    )(er, elT, adj_p, z_p)

    return out_p[:N, :out_dim]


# ---------------------------------------------------------------------------
# Pure-JAX reference (mirrors the DGL GraphLayer forward, f32 throughout).
# ---------------------------------------------------------------------------
def graph_layer_ref(h, W, a_l, a_r, adj):
    z = h @ W
    el = z @ a_l
    er = z @ a_r
    e = er + el.T
    e = jnp.where(adj != 0, e, -jnp.inf)
    alpha = jax.nn.softmax(e, axis=1)
    alpha = jnp.where(adj != 0, alpha, 0.0)
    return alpha @ z


if __name__ == "__main__":
    N, in_dim, out_dim = 8, 16, 32

    key = jax.random.PRNGKey(0)
    k_h, k_fc, k_attn, k_adj = jax.random.split(key, 4)

    # Node features.
    h = jax.random.normal(k_h, (N, in_dim), dtype=jnp.float32)

    # fc: nn.Linear(in_dim, out_dim, bias=False) -> torch weight [out_dim, in_dim].
    fc_weight_torch = 0.1 * jax.random.normal(k_fc, (out_dim, in_dim), dtype=jnp.float32)
    W = fc_weight_torch.T  # [in_dim, out_dim]

    # attn_fc: nn.Linear(2*out_dim, 1, bias=False) -> torch weight [1, 2*out_dim].
    attn_weight_torch = 0.1 * jax.random.normal(k_attn, (1, 2 * out_dim), dtype=jnp.float32)
    a_l = attn_weight_torch[0, :out_dim].reshape(out_dim, 1)   # applied to src z
    a_r = attn_weight_torch[0, out_dim:].reshape(out_dim, 1)   # applied to dst z

    # Dense int8 adjacency with self-loops so every node has >= 1 incoming edge
    # (mirrors the DGL requirement; zero in-degree rows would yield 0, not NaN).
    rand_adj = jax.random.uniform(k_adj, (N, N)) > 0.6
    adj = (rand_adj | jnp.eye(N, dtype=bool)).astype(jnp.int8)

    expected = graph_layer_ref(h, W, a_l, a_r, adj)

    # Full-precision (f32 MXU operand) path: tight check.
    out_f32 = jax.block_until_ready(
        graph_layer(h, W, a_l, a_r, adj, compute_dtype=jnp.float32))
    np.testing.assert_allclose(np.asarray(out_f32), np.asarray(expected),
                               rtol=1e-5, atol=1e-5)

    # bf16 MXU-operand fast path (default): looser tolerance reflects bf16
    # operand rounding; accumulation and softmax math remain f32.
    out_bf16 = jax.block_until_ready(
        graph_layer(h, W, a_l, a_r, adj, compute_dtype=jnp.bfloat16))
    np.testing.assert_allclose(np.asarray(out_bf16), np.asarray(expected),
                               rtol=3e-2, atol=3e-2)

    print("KERNEL_OK")
</pallas_src>

<mosaic_0001>
module attributes {stable_mosaic.version = 11 : i64} {
  func.func @_prologue_kernel(%arg0: i32, %arg1: memref<256x128xf32, #tpu.memory_space<vmem>>, %arg2: memref<128x128xf32, #tpu.memory_space<vmem>>, %arg3: memref<128x128xf32, #tpu.memory_space<vmem>>, %arg4: memref<256x128xf32, #tpu.memory_space<vmem>>, %arg5: memref<256x128xf32, #tpu.memory_space<vmem>>) attributes {dimension_semantics = [#tpu.dimension_semantics<parallel>], iteration_bounds = array<i64: 2>, scalar_prefetch = 0 : i64, scratch_operands = 0 : i64, tpu.core_type = #tpu.core_type<tc>, window_params = [{transform_indices = @transform_0, window_bounds = array<i64: 256, 128>}, {pipeline_mode = #tpu.pipeline_mode<synchronous>, transform_indices = @transform_1, window_bounds = array<i64: 128, 128>}, {pipeline_mode = #tpu.pipeline_mode<synchronous>, transform_indices = @transform_2, window_bounds = array<i64: 128, 128>}, {transform_indices = @transform_3, window_bounds = array<i64: 256, 128>}, {transform_indices = @transform_4, window_bounds = array<i64: 256, 128>}]} {
    %c0 = arith.constant 0 : index
    %c0_0 = arith.constant 0 : index
    %0 = vector.load %arg1[%c0, %c0_0] : memref<256x128xf32, #tpu.memory_space<vmem>>, vector<256x128xf32>
    %c0_1 = arith.constant 0 : index
    %c0_2 = arith.constant 0 : index
    %1 = vector.load %arg2[%c0_1, %c0_2] : memref<128x128xf32, #tpu.memory_space<vmem>>, vector<128x128xf32>
    %cst = arith.constant dense<0.000000e+00> : vector<256x128xf32>
    %2 = tpu.matmul %0, %1, %cst {dimension_numbers = #tpu.dot_dimension_numbers<[1], [0], [0], [1], [0, 0, 1, 1], [], []>} : vector<256x128xf32>, vector<128x128xf32>, vector<256x128xf32> -> vector<256x128xf32>
    %c0_3 = arith.constant 0 : index
    %c0_4 = arith.constant 0 : index
    %3 = vector.load %arg4[%c0_3, %c0_4] : memref<256x128xf32, #tpu.memory_space<vmem>>, vector<256x128xf32>
    tpu.vector_store %arg4[%c0_3, %c0_4], %2 {strides = array<i32>} : memref<256x128xf32, #tpu.memory_space<vmem>>, vector<256x128xf32>,
    %c0_5 = arith.constant 0 : index
    %c0_6 = arith.constant 0 : index
    %4 = vector.load %arg3[%c0_5, %c0_6] : memref<128x128xf32, #tpu.memory_space<vmem>>, vector<128x128xf32>
    %cst_7 = arith.constant dense<0.000000e+00> : vector<256x128xf32>
    %5 = tpu.matmul %2, %4, %cst_7 {dimension_numbers = #tpu.dot_dimension_numbers<[1], [0], [0], [1], [0, 0, 1, 1], [], []>} : vector<256x128xf32>, vector<128x128xf32>, vector<256x128xf32> -> vector<256x128xf32>
    %c0_8 = arith.constant 0 : index
    %c0_9 = arith.constant 0 : index
    %6 = vector.load %arg5[%c0_8, %c0_9] : memref<256x128xf32, #tpu.memory_space<vmem>>, vector<256x128xf32>
    tpu.vector_store %arg5[%c0_8, %c0_9], %5 {strides = array<i32>} : memref<256x128xf32, #tpu.memory_space<vmem>>, vector<256x128xf32>,
    return
  }
  func.func @transform_0(%arg0: i32) -> (i32, i32) {
    %c0_i32 = arith.constant 0 : i32
    %c0_i32_0 = arith.constant 0 : i32
    return %arg0, %c0_i32 : i32, i32
  }
  func.func @transform_1(%arg0: i32) -> (i32, i32) {
    %c0_i32 = arith.constant 0 : i32
    %c0_i32_0 = arith.constant 0 : i32
    %c0_i32_1 = arith.constant 0 : i32
    return %c0_i32, %c0_i32_0 : i32, i32
  }
  func.func @transform_2(%arg0: i32) -> (i32, i32) {
    %c0_i32 = arith.constant 0 : i32
    %c0_i32_0 = arith.constant 0 : i32
    %c0_i32_1 = arith.constant 0 : i32
    return %c0_i32, %c0_i32_0 : i32, i32
  }
  func.func @transform_3(%arg0: i32) -> (i32, i32) {
    %c0_i32 = arith.constant 0 : i32
    %c0_i32_0 = arith.constant 0 : i32
    return %arg0, %c0_i32 : i32, i32
  }
  func.func @transform_4(%arg0: i32) -> (i32, i32) {
    %c0_i32 = arith.constant 0 : i32
    %c0_i32_0 = arith.constant 0 : i32
    return %arg0, %c0_i32 : i32, i32
  }
}

</mosaic_0001>

<bundles_post_ra>
// kernel: tpu_custom_call.1
= control target key start
LH: loop header
LB: loop body
LE: loop exit
PB: predicated region body
PF: predicated region fallthrough
CT: control target
= control target key end

     0   :  { %10 = vsyncpa [#allocation3], 0  ;;  %s2034_s0 = inlined_call_operand.hbm [shape: f32[512,128], index: 0, kind: input, shape index: {}]   ;;  %s2035_s1 = inlined_call_operand.hbm [shape: f32[128,128], index: 1, kind: input, shape index: {}]   ;;  %s2036_s2 = inlined_call_operand.hbm [shape: f32[128,128], index: 2, kind: input, shape index: {}]   ;;  %s2037_s3 = inlined_call_operand.hbm [shape: f32[512,128], index: 3, kind: output, shape index: {0}]   ;;  %s2038_s4 = inlined_call_operand.hbm [shape: f32[512,128], index: 4, kind: output, shape index: {1}]  }
   0x1   :  { %12 = vsyncpa [#allocation3 + $0x1], 0 }
   0x2   :  { %13 = vsyncpa [#allocation6], 0 }
   0x3   :  { %14 = vsyncpa [#allocation4], 0 }
   0x4   :  { %16 = vsyncpa [#allocation4 + $0x1], 0 }
   0x5   :  { %17 = vsyncpa [#allocation10], 0 }
   0x6   :  { %19 = vsyncpa [#allocation10 + $0x1], 0  ;;  %s1641_s15 = smov 0   ;;  %s1643_s16 = smov 0  }
   0x7   :  { %s1645_s17 = smov 0   ;;  %s1647_s18 = smov 0  }
   0x8 LB: > { %s1662_s19 = sadd.s32 4294967295, %s1605_s18   ;;  %s996_s20 = sadd.s32 4294967294, %s1605_s18   ;;  %s1605_s18 = sphi %s1647_s18, %s2058_s18   ;;  %s1601_s17 = sphi %s1645_s17, %s2057_s17   ;;  %s1597_s16 = sphi %s1643_s16, %s2056_s16   ;;  %s1593_s15 = sphi %s1641_s15, %s2055_s15  }
   0x9   : > { %p45_p0 = scmp.ne.s32.totalorder %s1597_s16, %s1593_s15  ;;  %p2039_p1 = scmp.eq.s32.totalorder %s1662_s19, 0 }
   0xa   : > { %p117_p3 = scmp.eq.s32.totalorder %s996_s20, 1  ;;  %p997_p5 = scmp.ge.s32.totalorder %s1605_s18, 1 }
   0xb   : > { %p1671_p4 = por %p2039_p1, %p45_p0  ;;  %p150_p7 = scmp.lt.s32.totalorder %s1605_s18, 3 }
   0xc   : > { %p1676_p6 = por %p117_p3, %p45_p0  ;;  %s1607_s24 = smov [#allocation5]  }
   0xd   : > { %s2042_s21 = scalar_select %p1671_p4, 1, 0 }
   0xe   : > { %s2043_s22 = scalar_select %p1676_p6, 1, 0 }
   0xf   : > { %p1681_p8 = pnand %p997_p5, %p150_p7  ;;  %s162_s25 = sshll.u32 %s1607_s24, 4  ;;  %s1685_s25 = int_to_ptr.vmem [resolvable:$true] %s162_s25 }
  0x10   : > { %s1608_s27 = smov [#allocation7]   ;;  %s1417_s5 = scalar_lea.hbm %s2035_s1, 2048 }
  0x11   : > { %p1355_p9 = pneg %p1681_p8  ;;  %s175_s28 = sshll.u32 %s1608_s27, 4  ;;  %s1696_s28 = int_to_ptr.vmem [resolvable:$true] %s175_s28 }
  0x12   : > { %p1418_p12 = scmp.ne.s32.totalorder %s2035_s1, %s1417_s5  ;;  %p1424_p5 = scmp.lt.u32.totalorder %s1417_s5, %s2035_s1 }
  0x13   : > { %p1692_p11 = pnand %p1355_p9, %p2039_p1 }
  0x15   : > { %p1419_p13 = pneg %p1692_p11 }
  0x17   : > { %p1420_p0 = pnand %p1419_p13, %p1418_p12 }
  0x19   : > { %p1421_p3 = pneg %p1420_p0 }
  0x1b   : > { %p1426_p7 = pnand %p1424_p5, %p1421_p3 }
  0x1d   : > { %1429 = shalt.err (!%p1426_p7)
}
  0x1e   : > { %s1430_s10 = scalar_lea.vmem %s1685_s25, 2048  ;;  %p1438_p2 = scmp.lt.s32.totalorder %s1685_s25, %s1685_s25 }
  0x1f   : > { %p1431_p9 = scmp.ne.s32.totalorder %s1685_s25, %s1430_s10  ;;  %p1439_p12 = scmp.lt.s32.totalorder %s1430_s10, %s1430_s10 }
  0x21   : > { %p1433_p10 = pnand %p1431_p9, %p1419_p13  ;;  %p1440_p0 = por %p1439_p12, %p1438_p2 }
  0x23   : > { %p1434_p1 = pneg %p1433_p10 }
  0x25   : > { %p1441_p6 = pnand %p1440_p0, %p1434_p1 }
  0x27   : > { %1444 = shalt.err (!%p1441_p6)
}
  0x28   : > { %s1609_s11 = smov 128   ;;  %s1610_s12 = smov 8  }
  0x29   : > { %1358 = dma.hbm_to_vmem [thread:$0]  (!%p1692_p11), %s2035_s1, 2048, %s1685_s25, [#allocation6], %s1609_s11, %s1609_s11, %s1610_s12  }
  0x2a   : > { %s1445_s27 = scalar_lea.hbm %s2036_s2, 2048 }
  0x2b   : > { %p1446_p1 = scmp.ne.s32.totalorder %s2036_s2, %s1445_s27  ;;  %p1452_p10 = scmp.lt.u32.totalorder %s1445_s27, %s2036_s2 }
  0x2d   : > { %p1448_p2 = pnand %p1446_p1, %p1419_p13 }
  0x2f   : > { %p1449_p6 = pneg %p1448_p2 }
  0x31   : > { %p1454_p3 = pnand %p1452_p10, %p1449_p6 }
  0x33   : > { %1457 = shalt.err (!%p1454_p3)
}
  0x34   : > { %s1458_s25 = scalar_lea.vmem %s1696_s28, 2048  ;;  %p1466_p12 = scmp.lt.s32.totalorder %s1696_s28, %s1696_s28 }
  0x35   : > { %p1459_p5 = scmp.ne.s32.totalorder %s1696_s28, %s1458_s25  ;;  %p1467_p0 = scmp.lt.s32.totalorder %s1458_s25, %s1458_s25 }
  0x37   : > { %p1461_p7 = pnand %p1459_p5, %p1419_p13  ;;  %p1468_p1 = por %p1467_p0, %p1466_p12 }
  0x39   : > { %p1462_p9 = pneg %p1461_p7 }
  0x3b   : > { %p1469_p2 = pnand %p1468_p1, %p1462_p9 }
  0x3d   : > { %1472 = shalt.err (!%p1469_p2)
}
  0x3e   : > { %1361 = dma.hbm_to_vmem [thread:$0]  (!%p1692_p11), %s2036_s2, 2048, %s1696_s28, [#allocation6], %s1609_s11, %s1609_s11, %s1610_s12  }
  0x3f   : > { %s1757_s26 = sadd.s32 1, %s1605_s18   ;;  %s32_s9 = sadd.s32 1, %s1601_s17 }
  0x40   : > { %s29_s10 = ssub.s32 %s1605_s18, %s1757_s26  ;;  %p39_p13 = scmp.ne.s32.totalorder %s1601_s17, %s1597_s16 }
  0x41   : > { %p30_p6 = scmp.eq.s32.totalorder %s29_s10, 0  ;;  %p40_p10 = scmp.eq.s32.totalorder %s1605_s18, 0 }
  0x42   : > { %p2046_p3 = scmp.eq.s32.totalorder %s1662_s19, 1  ;;  %p1375_p7 = scmp.lt.s32.totalorder %s1605_s18, 2 }
  0x43   : > { %s1773_s14 = scalar_select %p30_p6, %s1601_s17, %s32_s9  }
  0x44   : > { %p1767_p5 = por %p2046_p3, %p39_p13  ;;  %p41_p9 = por %p40_p10, %p39_p13 }
  0x45   : > { %s189_s20 = sand.u32 1, %s1601_s17   ;;  %s1018_s28 = sshll.u32 %s1605_s18, 12 }
  0x46   : > { %s2047_s13 = scalar_select %p1767_p5, 1, 0 }
  0x47   : > { %s1001_s24 = sshll.u32 %s189_s20, 8  ;;  %s1780_s30 = scalar_lea.hbm %s2034_s0, %s1018_s28 }
  0x48   : > { %s193_s5 = scalar_lea.vmem [#allocation2], %s1001_s24  ;;  %p1784_p11 = pnand %p1375_p7, %p41_p9 }
  0x49   : > { %s200_s6 = sshll.u32 %s193_s5, 4  ;;  %s1788_s7 = scalar_lea.sflag [#allocation3], %s189_s20  ;;  %s1782_s6 = int_to_ptr.vmem [resolvable:$true] %s200_s6 }
  0x4a   : > { %s1473_s8 = scalar_lea.hbm %s1780_s30, 4096  ;;  %p1475_p0 = pneg %p1784_p11 }
  0x4b   : > { %p1474_p12 = scmp.ne.s32.totalorder %s1780_s30, %s1473_s8  ;;  %s1478_s24 = scalar_lea.hbm %s2034_s0, 8192 }
  0x4c   : > { %p1479_p13 = scmp.lt.u32.totalorder %s1780_s30, %s2034_s0  ;;  %p1480_p6 = scmp.lt.u32.totalorder %s1478_s24, %s1473_s8 }
  0x4d   : > { %p1476_p1 = pnand %p1475_p0, %p1474_p12  ;;  %p1482_p3 = scmp.lt.u32.totalorder %s1473_s8, %s1780_s30 }
  0x4e   : > { %p1481_p10 = por %p1480_p6, %p1479_p13 }
  0x4f   : > { %p1477_p2 = pneg %p1476_p1 }
  0x50   : > { %p1483_p7 = por %p1482_p3, %p1481_p10 }
  0x52   : > { %p1484_p9 = pnand %p1483_p7, %p1477_p2 }
  0x54   : > { %1487 = shalt.err (!%p1484_p9)
}
  0x55   : > { %s1488_s20 = scalar_lea.vmem %s1782_s6, 4096  ;;  %s1611_s29 = smov [#allocation2]  }
  0x56   : > { %p1489_p12 = scmp.ne.s32.totalorder %s1782_s6, %s1488_s20  ;;  %s1493_s5 = sshll.u32 %s1611_s29, 4  ;;  %s1494_s5 = int_to_ptr.vmem [resolvable:$false] %s1493_s5 }
  0x57   : > { %s1495_s9 = scalar_lea.vmem %s1494_s5, 8192  ;;  %p1496_p4 = scmp.lt.s32.totalorder %s1782_s6, %s1494_s5 }
  0x58   : > { %p1491_p1 = pnand %p1489_p12, %p1475_p0  ;;  %p1497_p13 = scmp.lt.s32.totalorder %s1495_s9, %s1488_s20 }
  0x5a   : > { %p1492_p5 = pneg %p1491_p1  ;;  %p1498_p6 = por %p1497_p13, %p1496_p4 }
  0x5c   : > { %p1499_p10 = pnand %p1498_p6, %p1492_p5 }
  0x5e   : > { %1502 = shalt.err (!%p1499_p10)
}
  0x5f   : > { %1365 = dma.hbm_to_vmem [thread:$0]  (!%p1784_p11), %s1780_s30, 4096, %s1782_s6, %s1788_s7, %s1609_s11, %s1609_s11, %s1610_s12  }
  0x60   : > { %212 = sbr.rel (%p1681_p8) target bundleno = 643 (0x283), region = 32  ;;  %s1822_s8 = sand.u32 (!%p1681_p8), 1, %s1597_s16  }
  0x61   : > { %s1825_s10 = sshll.u32 (!%p1681_p8), %s1822_s8, 8  ;;  %s215_s25 = scalar_lea.sflag (!%p1681_p8), [#allocation3], %s1822_s8 }
  0x62   : > { %s1829_s24 = scalar_lea.vmem (!%p1681_p8), [#allocation2], %s1825_s10  ;;  %p2049_p4 = scmp.ne.s32.totalorder (!%p1681_p8), %s2042_s21, 0 }
  0x67   : > { %1576 = dma.done.wait (%p2049_p4), %s215_s25, 4096  }
  0x68   : > { %1578 = vsyncadd (%p2049_p4), %s215_s25, 4294963200  ;;  %p2050_p5 = scmp.eq.s32.totalorder %s1662_s19, 0 }
  0x6a   : > { %1580 = dma.done.wait (%p2050_p5), [#allocation6], 4096   ;;  %p2051_p8 = pmov %p2050_p5 }
  0x6b   : > { %v291_v0 = vld [vmem:[#allocation5] sm:$0xff]  ;;  %v292_v1 = vld [vmem:[#allocation5 + $0x8] sm:$0xff]  ;;  %v293_v2 = vld [vmem:[#allocation5 + $0x10] sm:$0xff]  ;;  %s1872_s21 = scalar_lea.vmem [#allocation8], %s1825_s10  ;;  %s1019_s23 = sshll.u32 %s1662_s19, 12 }
  0x6c   : > { %1582 = vsyncadd (%p2051_p8), [#allocation6], 4294963200  ;;  %v1277_v3 = vpack.c.bf16 %v292_v1, %v291_v0  ;;  %v294_v4 = vld [vmem:[#allocation5 + $0x18] sm:$0xff]  ;;  %v295_v6 = vld [vmem:[#allocation5 + $0x20] sm:$0xff]  ;;  %s856_s11 = sshll.u32 %s1872_s21, 4  ;;  %s1913_s6 = scalar_lea.hbm %s2037_s3, %s1019_s23  ;;  %s1915_s11 = int_to_ptr.vmem [resolvable:$true] %s856_s11 }
  0x6d   : > { %v1281_v5 = vpack.c.bf16 %v294_v4, %v293_v2  ;;  %v296_v7 = vld [vmem:[#allocation5 + $0x28] sm:$0xff]  ;;  %v259_v9 = vld [vmem:[%s1829_s24] sm:$0xff]  ;;  %v297_v10 = vld [vmem:[#allocation5 + $0x30] sm:$0xff]  ;;  %s838_s7 = scalar_lea.sflag [#allocation4], %s1822_s8  ;;  %s1503_s28 = scalar_lea.vmem %s1915_s11, 4096 }
  0x6e   : > { %1278 = vmatprep.subr.bf16.mxu0 %v1277_v3  ;;  %v1285_v8 = vpack.c.bf16 %v296_v7, %v295_v6  ;;  %v298_v11 = vld [vmem:[#allocation5 + $0x38] sm:$0xff]  ;;  %1149 = vmatprep.mubr.f32.mxu0 %v259_v9  ;;  %v299_v13 = vld [vmem:[#allocation5 + $0x40] sm:$0xff]  ;;  %v300_v14 = vld [vmem:[#allocation5 + $0x48] sm:$0xff]  ;;  %p1504_p11 = scmp.ne.s32.totalorder %s1915_s11, %s1503_s28  ;;  %p2052_p0 = scmp.ne.s32.totalorder %s2047_s13, 0 }
  0x6f   : > { %1280 = vmatpush3.bf16.msra.mxu0 %v1277_v3  ;;  %v1289_v12 = vpack.c.bf16 %v298_v11, %v297_v10  ;;  %v1293_v15 = vpack.c.bf16 %v300_v14, %v299_v13  ;;  %v301_v16 = vld [vmem:[#allocation5 + $0x50] sm:$0xff]  ;;  %v302_v17 = vld [vmem:[#allocation5 + $0x58] sm:$0xff]  ;;  %v564_v18 = vld [vmem:[#allocation7] sm:$0xff]  ;;  %s1612_s27 = smov [#allocation8]  }
  0x70   : > { %1282 = vmatprep.subr.bf16.mxu0 %v1281_v5  ;;  %v565_v19 = vld [vmem:[#allocation7 + $0x8] sm:$0xff]  ;;  %v566_v20 = vld [vmem:[#allocation7 + $0x10] sm:$0xff]  ;;  %v1297_v21 = vpack.c.bf16 %v302_v17, %v301_v16  ;;  %v303_v22 = vld [vmem:[#allocation5 + $0x60] sm:$0xff]  ;;  %p1505_p2 = pnand %p1504_p11, %p2052_p0  ;;  %s1507_s20 = sshll.u32 %s1612_s27, 4  ;;  %s1508_s20 = int_to_ptr.vmem [resolvable:$false] %s1507_s20 }
  0x71   : > { %v1309_v23 = vpack.c.bf16 %v565_v19, %v564_v18  ;;  %v567_v24 = vld [vmem:[#allocation7 + $0x18] sm:$0xff]  ;;  %v304_v25 = vld [vmem:[#allocation5 + $0x68] sm:$0xff]  ;;  %v568_v27 = vld [vmem:[#allocation7 + $0x20] sm:$0xff]  ;;  %s1509_s29 = scalar_lea.vmem %s1508_s20, 8192  ;;  %p1510_p7 = scmp.lt.s32.totalorder %s1915_s11, %s1508_s20 }
  0x72   : > { %v1313_v26 = vpack.c.bf16 %v567_v24, %v566_v20  ;;  %v569_v28 = vld [vmem:[#allocation7 + $0x28] sm:$0xff]  ;;  %v1301_v29 = vpack.c.bf16 %v304_v25, %v303_v22  ;;  %v305_v30 = vld [vmem:[#allocation5 + $0x70] sm:$0xff]  ;;  %v306_v32 = vld [vmem:[#allocation5 + $0x78] sm:$0xff]  ;;  %p1506_p3 = pneg %p1505_p2  ;;  %p1511_p9 = scmp.lt.s32.totalorder %s1509_s29, %s1503_s28 }
  0x73   : > { %1284 = vmatpush3.bf16.msra.mxu0 %v1281_v5  ;;  %1310 = vmatprep.subr.bf16.mxu1 %v1309_v23  ;;  %v1317_v31 = vpack.c.bf16 %v569_v28, %v568_v27  ;;  %v570_v33 = vld [vmem:[#allocation7 + $0x30] sm:$0xff]  ;;  %v571_v34 = vld [vmem:[#allocation7 + $0x38] sm:$0xff]  ;;  %v1305_v35 = vpack.c.bf16 %v306_v32, %v305_v30  ;;  %v572_v37 = vld [vmem:[#allocation7 + $0x40] sm:$0xff] }
  0x74   : > { %1286 = vmatprep.subr.bf16.mxu0 %v1285_v8  ;;  %1312 = vmatpush3.bf16.msra.mxu1 %v1309_v23  ;;  %v1321_v36 = vpack.c.bf16 %v571_v34, %v570_v33  ;;  %v573_v38 = vld [vmem:[#allocation7 + $0x48] sm:$0xff]  ;;  %v574_v40 = vld [vmem:[#allocation7 + $0x50] sm:$0xff]  ;;  %v575_v41 = vld [vmem:[#allocation7 + $0x58] sm:$0xff]  ;;  %p1512_p12 = por %p1511_p9, %p1510_p7 }
  0x75   : > { %1314 = vmatprep.subr.bf16.mxu1 %v1313_v26  ;;  %v1325_v39 = vpack.c.bf16 %v573_v38, %v572_v37  ;;  %v260_v42 = vld [vmem:[%s1829_s24 + $0x8] sm:$0xff]  ;;  %v261_v43 = vld [vmem:[%s1829_s24 + $0x10] sm:$0xff]  ;;  %v1329_v44 = vpack.c.bf16 %v575_v41, %v574_v40  ;;  %v576_v45 = vld [vmem:[#allocation7 + $0x60] sm:$0xff] }
  0x76   : > { %v577_v46 = vld [vmem:[#allocation7 + $0x68] sm:$0xff]  ;;  %v262_v47 = vld [vmem:[%s1829_s24 + $0x18] sm:$0xff]  ;;  %v263_v48 = vld [vmem:[%s1829_s24 + $0x20] sm:$0xff]  ;;  %p1513_p1 = pnand %p1512_p12, %p1506_p3 }
  0x77   : > { %1288 = vmatpush3.bf16.msra.mxu0 %v1285_v8  ;;  %v1333_v49 = vpack.c.bf16 %v577_v46, %v576_v45  ;;  %v578_v50 = vld [vmem:[#allocation7 + $0x70] sm:$0xff]  ;;  %v579_v51 = vld [vmem:[#allocation7 + $0x78] sm:$0xff]  ;;  %v264_v52 = vld [vmem:[%s1829_s24 + $0x28] sm:$0xff] }
  0x78   : > { %1290 = vmatprep.subr.bf16.mxu0 %v1289_v12  ;;  %1316 = vmatpush3.bf16.msra.mxu1 %v1313_v26  ;;  %v265_v53 = vld [vmem:[%s1829_s24 + $0x30] sm:$0xff]  ;;  %v1337_v54 = vpack.c.bf16 %v579_v51, %v578_v50  ;;  %v266_v55 = vld [vmem:[%s1829_s24 + $0x38] sm:$0xff]  ;;  %v267_v56 = vld [vmem:[%s1829_s24 + $0x40] sm:$0xff] }
  0x79   : > { %1318 = vmatprep.subr.bf16.mxu1 %v1317_v31  ;;  %v268_v57 = vld [vmem:[%s1829_s24 + $0x48] sm:$0xff]  ;;  %v269_v58 = vld [vmem:[%s1829_s24 + $0x50] sm:$0xff]  ;;  %v270_v59 = vld [vmem:[%s1829_s24 + $0x58] sm:$0xff] }
  0x7a   : > { %v271_v60 = vld [vmem:[%s1829_s24 + $0x60] sm:$0xff]  ;;  %v272_v61 = vld [vmem:[%s1829_s24 + $0x68] sm:$0xff]  ;;  %v273_v62 = vld [vmem:[%s1829_s24 + $0x70] sm:$0xff] }
  0x7b   : > { %1292 = vmatpush3.bf16.msra.mxu0 %v1289_v12  ;;  %v274_v63 = vld [vmem:[%s1829_s24 + $0x78] sm:$0xff]  ;;  %v275_v0 = vld [vmem:[%s1829_s24 + $0x80] sm:$0xff]  ;;  %v276_v1 = vld [vmem:[%s1829_s24 + $0x88] sm:$0xff] }
  0x7c   : > { %1294 = vmatprep.subr.bf16.mxu0 %v1293_v15  ;;  %1320 = vmatpush3.bf16.msra.mxu1 %v1317_v31  ;;  %v277_v2 = vld [vmem:[%s1829_s24 + $0x90] sm:$0xff]  ;;  %v278_v3 = vld [vmem:[%s1829_s24 + $0x98] sm:$0xff]  ;;  %v279_v4 = vld [vmem:[%s1829_s24 + $0xa0] sm:$0xff] }
  0x7d   : > { %1322 = vmatprep.subr.bf16.mxu1 %v1321_v36  ;;  %v280_v5 = vld [vmem:[%s1829_s24 + $0xa8] sm:$0xff]  ;;  %v281_v6 = vld [vmem:[%s1829_s24 + $0xb0] sm:$0xff]  ;;  %v282_v7 = vld [vmem:[%s1829_s24 + $0xb8] sm:$0xff] }
  0x7e   : > { %v283_v8 = vld [vmem:[%s1829_s24 + $0xc0] sm:$0xff]  ;;  %v284_v9 = vld [vmem:[%s1829_s24 + $0xc8] sm:$0xff]  ;;  %v285_v10 = vld [vmem:[%s1829_s24 + $0xd0] sm:$0xff] }
  0x7f   : > { %1296 = vmatpush3.bf16.msra.mxu0 %v1293_v15  ;;  %v286_v11 = vld [vmem:[%s1829_s24 + $0xd8] sm:$0xff]  ;;  %v287_v12 = vld [vmem:[%s1829_s24 + $0xe0] sm:$0xff]  ;;  %v288_v13 = vld [vmem:[%s1829_s24 + $0xe8] sm:$0xff] }
  0x80   : > { %1298 = vmatprep.subr.bf16.mxu0 %v1297_v21  ;;  %1324 = vmatpush3.bf16.msra.mxu1 %v1321_v36  ;;  %v289_v14 = vld [vmem:[%s1829_s24 + $0xf0] sm:$0xff]  ;;  %v290_v15 = vld [vmem:[%s1829_s24 + $0xf8] sm:$0xff] }
  0x81   : > { %1326 = vmatprep.subr.bf16.mxu1 %v1325_v39 }
  0x83   : > { %1300 = vmatpush3.bf16.msra.mxu0 %v1297_v21 }
  0x84   : > { %1302 = vmatprep.subr.bf16.mxu0 %v1301_v29  ;;  %1328 = vmatpush3.bf16.msra.mxu1 %v1325_v39 }
  0x85   : > { %1330 = vmatprep.subr.bf16.mxu1 %v1329_v44 }
  0x87   : > { %1304 = vmatpush3.bf16.msra.mxu0 %v1301_v29 }
  0x88   : > { %1306 = vmatprep.subr.bf16.mxu0 %v1305_v35  ;;  %1332 = vmatpush3.bf16.msra.mxu1 %v1329_v44 }
  0x89   : > { %1334 = vmatprep.subr.bf16.mxu1 %v1333_v49 }
  0x8b   : > { %1308 = vmatpush3.bf16.msra.mxu0 %v1305_v35 }
  0x8c   : > { %1336 = vmatpush3.bf16.msra.mxu1 %v1333_v49 }
  0x8d   : > { %1338 = vmatprep.subr.bf16.mxu1 %v1337_v54 }
  0x8e   : > { %1150 = vmatmul.mubr.f32.vlgmr.msra.gmra.mrb[0].mxu0 %v260_v42 }
  0x8f   : > { %1152 = vmatprep.mubr.f32.mxu0 %v261_v43 }
  0x90   : > { %1340 = vmatpush3.bf16.msra.mxu1 %v1337_v54 }
  0x92   : > { %1153 = vmatmul.mubr.f32.gmra.mrb[2].mxu0 %v262_v47 }
  0x93   : > { %1155 = vmatprep.mubr.f32.mxu0 %v263_v48 }
  0x96   : > { %1156 = vmatmul.mubr.f32.gmra.mrb[4].mxu0 %v264_v52 }
  0x97   : > { %1158 = vmatprep.mubr.f32.mxu0 %v265_v53 }
  0x9a   : > { %1159 = vmatmul.mubr.f32.gmra.mrb[6].mxu0 %v266_v55 }
  0x9b   : > { %1161 = vmatprep.mubr.f32.mxu0 %v267_v56 }
  0x9e   : > { %1162 = vmatmul.mubr.f32.gmra.mrb[8].mxu0 %v268_v57 }
  0x9f   : > { %1164 = vmatprep.mubr.f32.mxu0 %v269_v58 }
  0xa2   : > { %1165 = vmatmul.mubr.f32.gmra.mrb[10].mxu0 %v270_v59 }
  0xa3   : > { %1167 = vmatprep.mubr.f32.mxu0 %v271_v60 }
  0xa6   : > { %1168 = vmatmul.mubr.f32.gmra.mrb[12].mxu0 %v272_v61 }
  0xa7   : > { %1170 = vmatprep.mubr.f32.mxu0 %v273_v62 }
  0xaa   : > { %1171 = vmatmul.mubr.f32.gmra.mrb[14].mxu0 %v274_v63 }
  0xab   : > { %1173 = vmatprep.mubr.f32.mxu0 %v275_v0 }
  0xae   : > { %1174 = vmatmul.mubr.f32.gmra.mrb[16].mxu0 %v276_v1 }
  0xaf   : > { %1176 = vmatprep.mubr.f32.mxu0 %v277_v2 }
  0xb2   : > { %1177 = vmatmul.mubr.f32.gmra.mrb[18].mxu0 %v278_v3 }
  0xb3   : > { %1179 = vmatprep.mubr.f32.mxu0 %v279_v4 }
  0xb6   : > { %1180 = vmatmul.mubr.f32.gmra.mrb[20].mxu0 %v280_v5 }
  0xb7   : > { %1182 = vmatprep.mubr.f32.mxu0 %v281_v6 }
  0xba   : > { %1183 = vmatmul.mubr.f32.gmra.mrb[22].mxu0 %v282_v7 }
  0xbb   : > { %1185 = vmatprep.mubr.f32.mxu0 %v283_v8 }
  0xbe   : > { %1186 = vmatmul.mubr.f32.gmra.mrb[24].mxu0 %v284_v9 }
  0xbf   : > { %1188 = vmatprep.mubr.f32.mxu0 %v285_v10 }
  0xc2   : > { %1189 = vmatmul.mubr.f32.gmra.mrb[26].mxu0 %v286_v11 }
  0xc3   : > { %1191 = vmatprep.mubr.f32.mxu0 %v287_v12 }
  0xc6   : > { %1192 = vmatmul.mubr.f32.gmra.mrb[28].mxu0 %v288_v13 }
  0xc7   : > { %1194 = vmatprep.mubr.f32.mxu0 %v289_v14 }
  0xca   : > { %1195 = vmatmul.mubr.f32.gmra.mrb[30].mxu0 %v290_v15 }
 0x161   : > { %v1151_v16 = vpop.f32.mrb[0].mxu0 }
 0x162   : > { %533 = vst [vmem:[%s1872_s21 + $0x8] sm:$0xff] %v1151_v16  ;;  %v373_v17 = vpop.f32.mrb[1].mxu0 }
 0x163   : > { %532 = vst [vmem:[%s1872_s21] sm:$0xff] %v373_v17  ;;  %1229 = vmatprep.mubr.f32.mxu1 %v373_v17 }
 0x164   : > { %1230 = vmatmul.mubr.f32.vlgmr.msra.gmra.mrb[0].mxu1 %v1151_v16 }
 0x165   : > { %v1154_v18 = vpop.f32.mrb[2].mxu0 }
 0x166   : > { %535 = vst [vmem:[%s1872_s21 + $0x18] sm:$0xff] %v1154_v18  ;;  %v383_v19 = vpop.f32.mrb[3].mxu0 }
 0x167   : > { %534 = vst [vmem:[%s1872_s21 + $0x10] sm:$0xff] %v383_v19  ;;  %1232 = vmatprep.mubr.f32.mxu1 %v383_v19 }
 0x168   : > { %1233 = vmatmul.mubr.f32.gmra.mrb[2].mxu1 %v1154_v18 }
 0x169   : > { %v1157_v20 = vpop.f32.mrb[4].mxu0 }
 0x16a   : > { %537 = vst [vmem:[%s1872_s21 + $0x28] sm:$0xff] %v1157_v20  ;;  %v393_v21 = vpop.f32.mrb[5].mxu0 }
 0x16b   : > { %536 = vst [vmem:[%s1872_s21 + $0x20] sm:$0xff] %v393_v21  ;;  %1235 = vmatprep.mubr.f32.mxu1 %v393_v21 }
 0x16c   : > { %1236 = vmatmul.mubr.f32.gmra.mrb[4].mxu1 %v1157_v20 }
 0x16d   : > { %v1160_v22 = vpop.f32.mrb[6].mxu0 }
 0x16e   : > { %539 = vst [vmem:[%s1872_s21 + $0x38] sm:$0xff] %v1160_v22  ;;  %v403_v23 = vpop.f32.mrb[7].mxu0 }
 0x16f   : > { %538 = vst [vmem:[%s1872_s21 + $0x30] sm:$0xff] %v403_v23  ;;  %1238 = vmatprep.mubr.f32.mxu1 %v403_v23 }
 0x170   : > { %1239 = vmatmul.mubr.f32.gmra.mrb[6].mxu1 %v1160_v22 }
 0x171   : > { %v1163_v24 = vpop.f32.mrb[8].mxu0 }
 0x172   : > { %541 = vst [vmem:[%s1872_s21 + $0x48] sm:$0xff] %v1163_v24  ;;  %v413_v25 = vpop.f32.mrb[9].mxu0 }
 0x173   : > { %540 = vst [vmem:[%s1872_s21 + $0x40] sm:$0xff] %v413_v25  ;;  %1241 = vmatprep.mubr.f32.mxu1 %v413_v25 }
 0x174   : > { %1242 = vmatmul.mubr.f32.gmra.mrb[8].mxu1 %v1163_v24 }
 0x175   : > { %v1166_v26 = vpop.f32.mrb[10].mxu0 }
 0x176   : > { %543 = vst [vmem:[%s1872_s21 + $0x58] sm:$0xff] %v1166_v26  ;;  %v423_v27 = vpop.f32.mrb[11].mxu0 }
 0x177   : > { %542 = vst [vmem:[%s1872_s21 + $0x50] sm:$0xff] %v423_v27  ;;  %1244 = vmatprep.mubr.f32.mxu1 %v423_v27 }
 0x178   : > { %1245 = vmatmul.mubr.f32.gmra.mrb[10].mxu1 %v1166_v26 }
 0x179   : > { %v1169_v28 = vpop.f32.mrb[12].mxu0 }
 0x17a   : > { %545 = vst [vmem:[%s1872_s21 + $0x68] sm:$0xff] %v1169_v28  ;;  %v433_v29 = vpop.f32.mrb[13].mxu0 }
 0x17b   : > { %544 = vst [vmem:[%s1872_s21 + $0x60] sm:$0xff] %v433_v29  ;;  %1247 = vmatprep.mubr.f32.mxu1 %v433_v29 }
 0x17c   : > { %1248 = vmatmul.mubr.f32.gmra.mrb[12].mxu1 %v1169_v28 }
 0x17d   : > { %v1172_v30 = vpop.f32.mrb[14].mxu0 }
 0x17e   : > { %547 = vst [vmem:[%s1872_s21 + $0x78] sm:$0xff] %v1172_v30  ;;  %v443_v31 = vpop.f32.mrb[15].mxu0 }
 0x17f   : > { %546 = vst [vmem:[%s1872_s21 + $0x70] sm:$0xff] %v443_v31  ;;  %1250 = vmatprep.mubr.f32.mxu1 %v443_v31 }
 0x180   : > { %1251 = vmatmul.mubr.f32.gmra.mrb[14].mxu1 %v1172_v30 }
 0x181   : > { %v1175_v32 = vpop.f32.mrb[16].mxu0 }
 0x182   : > { %549 = vst [vmem:[%s1872_s21 + $0x88] sm:$0xff] %v1175_v32  ;;  %v453_v33 = vpop.f32.mrb[17].mxu0 }
 0x183   : > { %548 = vst [vmem:[%s1872_s21 + $0x80] sm:$0xff] %v453_v33  ;;  %1253 = vmatprep.mubr.f32.mxu1 %v453_v33 }
 0x184   : > { %1254 = vmatmul.mubr.f32.gmra.mrb[16].mxu1 %v1175_v32 }
 0x185   : > { %v1178_v34 = vpop.f32.mrb[18].mxu0 }
 0x186   : > { %551 = vst [vmem:[%s1872_s21 + $0x98] sm:$0xff] %v1178_v34  ;;  %v463_v35 = vpop.f32.mrb[19].mxu0 }
 0x187   : > { %550 = vst [vmem:[%s1872_s21 + $0x90] sm:$0xff] %v463_v35  ;;  %1256 = vmatprep.mubr.f32.mxu1 %v463_v35 }
 0x188   : > { %1257 = vmatmul.mubr.f32.gmra.mrb[18].mxu1 %v1178_v34 }
 0x189   : > { %v1181_v36 = vpop.f32.mrb[20].mxu0 }
 0x18a   : > { %553 = vst [vmem:[%s1872_s21 + $0xa8] sm:$0xff] %v1181_v36  ;;  %v473_v37 = vpop.f32.mrb[21].mxu0 }
 0x18b   : > { %552 = vst [vmem:[%s1872_s21 + $0xa0] sm:$0xff] %v473_v37  ;;  %1259 = vmatprep.mubr.f32.mxu1 %v473_v37 }
 0x18c   : > { %1260 = vmatmul.mubr.f32.gmra.mrb[20].mxu1 %v1181_v36 }
 0x18d   : > { %v1184_v38 = vpop.f32.mrb[22].mxu0 }
 0x18e   : > { %555 = vst [vmem:[%s1872_s21 + $0xb8] sm:$0xff] %v1184_v38  ;;  %v483_v39 = vpop.f32.mrb[23].mxu0 }
 0x18f   : > { %554 = vst [vmem:[%s1872_s21 + $0xb0] sm:$0xff] %v483_v39  ;;  %1262 = vmatprep.mubr.f32.mxu1 %v483_v39 }
 0x190   : > { %1263 = vmatmul.mubr.f32.gmra.mrb[22].mxu1 %v1184_v38 }
 0x191   : > { %v1187_v40 = vpop.f32.mrb[24].mxu0 }
 0x192   : > { %557 = vst [vmem:[%s1872_s21 + $0xc8] sm:$0xff] %v1187_v40  ;;  %v493_v41 = vpop.f32.mrb[25].mxu0 }
 0x193   : > { %556 = vst [vmem:[%s1872_s21 + $0xc0] sm:$0xff] %v493_v41  ;;  %1265 = vmatprep.mubr.f32.mxu1 %v493_v41 }
 0x194   : > { %1266 = vmatmul.mubr.f32.gmra.mrb[24].mxu1 %v1187_v40 }
 0x195   : > { %v1190_v42 = vpop.f32.mrb[26].mxu0 }
 0x196   : > { %559 = vst [vmem:[%s1872_s21 + $0xd8] sm:$0xff] %v1190_v42  ;;  %v503_v43 = vpop.f32.mrb[27].mxu0 }
 0x197   : > { %558 = vst [vmem:[%s1872_s21 + $0xd0] sm:$0xff] %v503_v43  ;;  %1268 = vmatprep.mubr.f32.mxu1 %v503_v43 }
 0x198   : > { %1269 = vmatmul.mubr.f32.gmra.mrb[26].mxu1 %v1190_v42 }
 0x199   : > { %v1193_v44 = vpop.f32.mrb[28].mxu0 }
 0x19a   : > { %561 = vst [vmem:[%s1872_s21 + $0xe8] sm:$0xff] %v1193_v44  ;;  %v513_v45 = vpop.f32.mrb[29].mxu0 }
 0x19b   : > { %560 = vst [vmem:[%s1872_s21 + $0xe0] sm:$0xff] %v513_v45  ;;  %1271 = vmatprep.mubr.f32.mxu1 %v513_v45 }
 0x19c   : > { %1272 = vmatmul.mubr.f32.gmra.mrb[28].mxu1 %v1193_v44 }
 0x19d   : > { %v1196_v46 = vpop.f32.mrb[30].mxu0 }
 0x19e   : > { %563 = vst [vmem:[%s1872_s21 + $0xf8] sm:$0xff] %v1196_v46  ;;  %v523_v47 = vpop.f32.mrb[31].mxu0 }
 0x19f   : > { %562 = vst [vmem:[%s1872_s21 + $0xf0] sm:$0xff] %v523_v47  ;;  %1274 = vmatprep.mubr.f32.mxu1 %v523_v47 }
 0x1a0   : > { %1275 = vmatmul.mubr.f32.gmra.mrb[30].mxu1 %v1196_v46 }
 0x1a1   : > { %1516 = shalt.err (!%p1513_p1)
}
 0x1a2   : > { %s1517_s5 = scalar_lea.hbm %s1913_s6, 4096  ;;  %s1521_s24 = scalar_lea.hbm %s2037_s3, 8192 }
 0x1a3   : > { %p1518_p13 = scmp.ne.s32.totalorder %s1913_s6, %s1517_s5  ;;  %p1522_p4 = scmp.lt.u32.totalorder %s1913_s6, %s2037_s3 }
 0x1a4   : > { %p1523_p5 = scmp.lt.u32.totalorder %s1521_s24, %s1517_s5  ;;  %p1525_p11 = scmp.lt.u32.totalorder %s1517_s5, %s1913_s6 }
 0x1a5   : > { %p1519_p6 = pnand %p1518_p13, %p2052_p0 }
 0x1a6   : > { %p1524_p8 = por %p1523_p5, %p1522_p4 }
 0x1a7   : > { %p1520_p10 = pneg %p1519_p6 }
 0x1a8   : > { %p1526_p2 = por %p1525_p11, %p1524_p8 }
 0x1aa   : > { %p1527_p3 = pnand %p1526_p2, %p1520_p10 }
 0x1ac   : > { %1530 = shalt.err (!%p1527_p3)
}
 0x1ad   : > { %s1613_s30 = smov 128   ;;  %s1614_s28 = smov 8  }
 0x1ae   : > { %1351 = dma.vmem_to_hbm [thread:$0]  (%p2052_p0), %s1915_s11, 4096, %s1913_s6, %s838_s7, %s1613_s30, %s1613_s30, %s1614_s28  }
 0x1af   : > { %s1945_s27 = scalar_lea.vmem [#allocation9], %s1825_s10  ;;  %s1983_s7 = scalar_lea.hbm %s2038_s4, %s1019_s23 }
 0x1b0   : > { %s872_s10 = sshll.u32 %s1945_s27, 4  ;;  %s843_s20 = scalar_lea.sflag [#allocation10], %s1822_s8  ;;  %s1985_s10 = int_to_ptr.vmem [resolvable:$true] %s872_s10 }
 0x1b1   : > { %s1531_s29 = scalar_lea.vmem %s1985_s10, 4096  ;;  %s1615_s19 = smov [#allocation9]  }
 0x1b2   : > { %p1532_p7 = scmp.ne.s32.totalorder %s1985_s10, %s1531_s29  ;;  %s1535_s5 = sshll.u32 %s1615_s19, 4  ;;  %s1536_s5 = int_to_ptr.vmem [resolvable:$false] %s1535_s5 }
 0x1b3   : > { %s1537_s9 = scalar_lea.vmem %s1536_s5, 8192  ;;  %p1538_p1 = scmp.lt.s32.totalorder %s1985_s10, %s1536_s5 }
 0x1b4   : > { %p1533_p9 = pnand %p1532_p7, %p2052_p0  ;;  %p1539_p13 = scmp.lt.s32.totalorder %s1537_s9, %s1531_s29 }
 0x1b6   : > { %p1534_p12 = pneg %p1533_p9  ;;  %p1540_p6 = por %p1539_p13, %p1538_p1 }
 0x1b8   : > { %p1541_p10 = pnand %p1540_p6, %p1534_p12 }
 0x237   : > { %v1231_v48 = vpop.f32.mrb[0].mxu1 }
 0x238   : > { %806 = vst [vmem:[%s1945_s27 + $0x8] sm:$0xff] %v1231_v48  ;;  %v646_v49 = vpop.f32.mrb[1].mxu1 }
 0x239   : > { %805 = vst [vmem:[%s1945_s27] sm:$0xff] %v646_v49 }
 0x23b   : > { %v1234_v50 = vpop.f32.mrb[2].mxu1 }
 0x23c   : > { %808 = vst [vmem:[%s1945_s27 + $0x18] sm:$0xff] %v1234_v50  ;;  %v656_v51 = vpop.f32.mrb[3].mxu1 }
 0x23d   : > { %807 = vst [vmem:[%s1945_s27 + $0x10] sm:$0xff] %v656_v51 }
 0x23f   : > { %v1237_v52 = vpop.f32.mrb[4].mxu1 }
 0x240   : > { %810 = vst [vmem:[%s1945_s27 + $0x28] sm:$0xff] %v1237_v52  ;;  %v666_v53 = vpop.f32.mrb[5].mxu1 }
 0x241   : > { %809 = vst [vmem:[%s1945_s27 + $0x20] sm:$0xff] %v666_v53 }
 0x243   : > { %v1240_v54 = vpop.f32.mrb[6].mxu1 }
 0x244   : > { %812 = vst [vmem:[%s1945_s27 + $0x38] sm:$0xff] %v1240_v54  ;;  %v676_v55 = vpop.f32.mrb[7].mxu1 }
 0x245   : > { %811 = vst [vmem:[%s1945_s27 + $0x30] sm:$0xff] %v676_v55 }
 0x247   : > { %v1243_v56 = vpop.f32.mrb[8].mxu1 }
 0x248   : > { %814 = vst [vmem:[%s1945_s27 + $0x48] sm:$0xff] %v1243_v56  ;;  %v686_v57 = vpop.f32.mrb[9].mxu1 }
 0x249   : > { %813 = vst [vmem:[%s1945_s27 + $0x40] sm:$0xff] %v686_v57 }
 0x24b   : > { %v1246_v58 = vpop.f32.mrb[10].mxu1 }
 0x24c   : > { %816 = vst [vmem:[%s1945_s27 + $0x58] sm:$0xff] %v1246_v58  ;;  %v696_v59 = vpop.f32.mrb[11].mxu1 }
 0x24d   : > { %815 = vst [vmem:[%s1945_s27 + $0x50] sm:$0xff] %v696_v59 }
 0x24f   : > { %v1249_v60 = vpop.f32.mrb[12].mxu1 }
 0x250   : > { %818 = vst [vmem:[%s1945_s27 + $0x68] sm:$0xff] %v1249_v60  ;;  %v706_v61 = vpop.f32.mrb[13].mxu1 }
 0x251   : > { %817 = vst [vmem:[%s1945_s27 + $0x60] sm:$0xff] %v706_v61 }
 0x253   : > { %v1252_v62 = vpop.f32.mrb[14].mxu1 }
 0x254   : > { %820 = vst [vmem:[%s1945_s27 + $0x78] sm:$0xff] %v1252_v62  ;;  %v716_v63 = vpop.f32.mrb[15].mxu1 }
 0x255   : > { %819 = vst [vmem:[%s1945_s27 + $0x70] sm:$0xff] %v716_v63 }
 0x257   : > { %v1255_v0 = vpop.f32.mrb[16].mxu1 }
 0x258   : > { %822 = vst [vmem:[%s1945_s27 + $0x88] sm:$0xff] %v1255_v0  ;;  %v726_v1 = vpop.f32.mrb[17].mxu1 }
 0x259   : > { %821 = vst [vmem:[%s1945_s27 + $0x80] sm:$0xff] %v726_v1 }
 0x25b   : > { %v1258_v2 = vpop.f32.mrb[18].mxu1 }
 0x25c   : > { %824 = vst [vmem:[%s1945_s27 + $0x98] sm:$0xff] %v1258_v2  ;;  %v736_v3 = vpop.f32.mrb[19].mxu1 }
 0x25d   : > { %823 = vst [vmem:[%s1945_s27 + $0x90] sm:$0xff] %v736_v3 }
 0x25f   : > { %v1261_v4 = vpop.f32.mrb[20].mxu1 }
 0x260   : > { %826 = vst [vmem:[%s1945_s27 + $0xa8] sm:$0xff] %v1261_v4  ;;  %v746_v5 = vpop.f32.mrb[21].mxu1 }
 0x261   : > { %825 = vst [vmem:[%s1945_s27 + $0xa0] sm:$0xff] %v746_v5 }
 0x263   : > { %v1264_v6 = vpop.f32.mrb[22].mxu1 }
 0x264   : > { %828 = vst [vmem:[%s1945_s27 + $0xb8] sm:$0xff] %v1264_v6  ;;  %v756_v7 = vpop.f32.mrb[23].mxu1 }
 0x265   : > { %827 = vst [vmem:[%s1945_s27 + $0xb0] sm:$0xff] %v756_v7 }
 0x267   : > { %v1267_v8 = vpop.f32.mrb[24].mxu1 }
 0x268   : > { %830 = vst [vmem:[%s1945_s27 + $0xc8] sm:$0xff] %v1267_v8  ;;  %v766_v9 = vpop.f32.mrb[25].mxu1 }
 0x269   : > { %829 = vst [vmem:[%s1945_s27 + $0xc0] sm:$0xff] %v766_v9 }
 0x26b   : > { %v1270_v10 = vpop.f32.mrb[26].mxu1 }
 0x26c   : > { %832 = vst [vmem:[%s1945_s27 + $0xd8] sm:$0xff] %v1270_v10  ;;  %v776_v11 = vpop.f32.mrb[27].mxu1 }
 0x26d   : > { %831 = vst [vmem:[%s1945_s27 + $0xd0] sm:$0xff] %v776_v11 }
 0x26f   : > { %v1273_v12 = vpop.f32.mrb[28].mxu1 }
 0x270   : > { %834 = vst [vmem:[%s1945_s27 + $0xe8] sm:$0xff] %v1273_v12  ;;  %v786_v13 = vpop.f32.mrb[29].mxu1 }
 0x271   : > { %833 = vst [vmem:[%s1945_s27 + $0xe0] sm:$0xff] %v786_v13 }
 0x273   : > { %v1276_v14 = vpop.f32.mrb[30].mxu1 }
 0x274   : > { %836 = vst [vmem:[%s1945_s27 + $0xf8] sm:$0xff] %v1276_v14  ;;  %v796_v15 = vpop.f32.mrb[31].mxu1 }
 0x275   : > { %835 = vst [vmem:[%s1945_s27 + $0xf0] sm:$0xff] %v796_v15 }
 0x276   : > { %1544 = shalt.err (!%p1541_p10)
}
 0x277   : > { %s1545_s23 = scalar_lea.hbm %s1983_s7, 4096  ;;  %s1549_s21 = scalar_lea.hbm %s2038_s4, 8192 }
 0x278   : > { %p1546_p4 = scmp.ne.s32.totalorder %s1983_s7, %s1545_s23  ;;  %p1550_p11 = scmp.lt.u32.totalorder %s1983_s7, %s2038_s4 }
 0x279   : > { %p1551_p2 = scmp.lt.u32.totalorder %s1549_s21, %s1545_s23  ;;  %p1553_p7 = scmp.lt.u32.totalorder %s1545_s23, %s1983_s7 }
 0x27a   : > { %p1547_p5 = pnand %p1546_p4, %p2052_p0 }
 0x27b   : > { %p1552_p3 = por %p1551_p2, %p1550_p11 }
 0x27c   : > { %p1548_p8 = pneg %p1547_p5 }
 0x27d   : > { %p1554_p9 = por %p1553_p7, %p1552_p3 }
 0x27f   : > { %p1555_p12 = pnand %p1554_p9, %p1548_p8 }
 0x281   : > { %1558 = shalt.err (!%p1555_p12)
}
 0x282   : > { %1352 = dma.vmem_to_hbm [thread:$0]  (%p2052_p0), %s1985_s10, 4096, %s1983_s7, %s843_s20, %s1613_s30, %s1613_s30, %s1614_s28  }
 0x283 PF: > { %s887_s11 = sand.u32 1, %s1593_s15   ;;  %p2053_p1 = scmp.ne.s32.totalorder %s2043_s22, 0 }
 0x284   : > { %p2054_p13 = scmp.ge.s32.totalorder %s1605_s18, 2  ;;  %s888_s6 = scalar_lea.sflag [#allocation4], %s887_s11 }
 0x286   : > { %p1367_p6 = pnand %p2054_p13, %p2053_p1 }
 0x288   : > { %1584 = dma.done.wait (!%p1367_p6), %s888_s6, 4096  }
 0x289   : > { %1586 = vsyncadd (!%p1367_p6), %s888_s6, 4294963200  ;;  %s897_s13 = scalar_lea.sflag [#allocation10], %s887_s11 }
 0x28a   : > { %1588 = dma.done.wait (!%p1367_p6), %s897_s13, 4096  }
 0x28b   : > { %1590 = vsyncadd (!%p1367_p6), %s897_s13, 4294963200  ;;  %p22_p0 = scmp.ge.s32.totalorder %s1757_s26, 4   ;;  %s2055_s15 = smov %s1597_s16 }
 0x28c   : > { %s2056_s16 = smov %s1601_s17  ;;  %s2057_s17 = smov %s1773_s14 }
 0x28d   : > { %s2058_s18 = smov %s1757_s26  ;;  %24 = sbr.rel (!%p22_p0) target bundleno = 8 (0x8), region = 102 }
 0x294   :  { %902 = vsyncpa [#allocation3], 1 }
 0x295   :  { %904 = vsyncpa [#allocation3 + $0x1], 1 }
 0x296   :  { %905 = vsyncpa [#allocation6], 1 }
 0x297   :  { %906 = vsyncpa [#allocation4], 1 }
 0x298   :  { %908 = vsyncpa [#allocation4 + $0x1], 1 }
 0x299   :  { %909 = vsyncpa [#allocation10], 1 }
 0x29a   :  { %911 = vsyncpa [#allocation10 + $0x1], 1 }

</bundles_post_ra>
